<compile_context>
chip_gen: v7x
topology: tpu7x:2x2x1
jax: 0.10.0
libtpu: 0.0.40
codegen_flags: <defaults>
</compile_context>

<pallas_src>
import jax
import jax.numpy as jnp
from jax.experimental import pallas as pl
from jax.experimental.pallas import tpu as pltpu


def _round_up(x, m):
    return ((x + m - 1) // m) * m


def _pad2d(x, rows, cols, dtype):
    """Zero-pad a 2-D array to (rows, cols) and cast to dtype."""
    r, c = x.shape
    return jnp.pad(x, ((0, rows - r), (0, cols - c))).astype(dtype)


# ----------------------------------------------------------------------------
# Pallas kernel: fusion + classifier hot path
# ----------------------------------------------------------------------------
def noatt_kernel(v_ref, q_ref, wv_ref, bv_ref, wq_ref, bq_ref, wc_ref, bc_ref,
                 out_ref, h_ref):
    # Fusion projections + elementwise fusion + classif activation.
    # Computed only on the first class tile of each batch tile; the fused
    # hidden state persists in VMEM scratch across the class-tile loop.
    @pl.when(pl.program_id(1) == 0)
    def _():
        h_v = jnp.tanh(
            jnp.dot(v_ref[...], wv_ref[...],
                    preferred_element_type=jnp.float32) + bv_ref[...])
        h_q = jnp.tanh(
            jnp.dot(q_ref[...], wq_ref[...],
                    preferred_element_type=jnp.float32) + bq_ref[...])
        # _fusion: element-wise product; _classif activation: tanh.
        # _classif dropout -> identity at inference time.
        h_ref[...] = jnp.tanh(h_v * h_q)

    # linear_classif on this streamed class-column tile of W_c.
    out_ref[...] = (
        jnp.dot(h_ref[...].astype(jnp.bfloat16), wc_ref[...],
                preferred_element_type=jnp.float32) + bc_ref[...])


def noatt_forward(input_v, x_q, params, *, tile_b=128, tile_c=256):
    """input_v: (B, dim_v) f32, x_q: (B, dim_q) f32 (output of seq2vec)."""
    B, dim_v = input_v.shape
    dim_q = x_q.shape[1]
    dim_h, num_classes = params["w_c"].shape

    # Padded, lane-dense shapes.
    dvp = _round_up(dim_v, 128)
    dqp = _round_up(dim_q, 128)
    dhp = _round_up(dim_h, 128)
    tb = min(tile_b, _round_up(B, 8))
    Bp = _round_up(B, tb)
    tc = min(tile_c, _round_up(num_classes, 128))
    ncp = _round_up(num_classes, tc)

    bf16, f32 = jnp.bfloat16, jnp.float32
    v_p = _pad2d(input_v, Bp, dvp, bf16)
    q_p = _pad2d(x_q, Bp, dqp, bf16)
    wv_p = _pad2d(params["w_v"], dvp, dhp, bf16)
    wq_p = _pad2d(params["w_q"], dqp, dhp, bf16)
    wc_p = _pad2d(params["w_c"], dhp, ncp, bf16)
    bv_p = _pad2d(params["b_v"], 1, dhp, f32)
    bq_p = _pad2d(params["b_q"], 1, dhp, f32)
    bc_p = _pad2d(params["b_c"], 1, ncp, f32)

    grid = (Bp // tb, ncp // tc)

    # Advisory cost so XLA can schedule the seq2vec gather around the kernel.
    flops = 2 * Bp * (dvp + dqp) * dhp + 2 * Bp * dhp * ncp
    bytes_accessed = (
        (v_p.size + q_p.size + wv_p.size + wq_p.size + wc_p.size) * 2
        + (bv_p.size + bq_p.size + bc_p.size) * 4
        + Bp * ncp * 4)
    cost = pl.CostEstimate(flops=flops,
                           transcendentals=3 * Bp * dhp,
                           bytes_accessed=bytes_accessed)

    # Explicit VMEM budget: double-buffered blocks + h scratch + headroom.
    vmem_need = (
        2 * tb * (dvp + dqp) * 2          # v, q tiles (bf16)
        + 2 * (dvp + dqp) * dhp * 2       # fusion weights (bf16)
        + 2 * dhp * tc * 2                # streamed w_c tile (bf16)
        + 2 * (2 * dhp + tc) * 4          # biases (f32)
        + 2 * tb * tc * 4                 # output tile (f32)
        + tb * dhp * 4)                   # h scratch (f32)
    vmem_limit = int(min(max(2 * vmem_need, 16 * 1024 * 1024),
                         64 * 1024 * 1024))

    out_p = pl.pallas_call(
        noatt_kernel,
        out_shape=jax.ShapeDtypeStruct((Bp, ncp), jnp.float32),
        grid_spec=pltpu.PrefetchScalarGridSpec(
            num_scalar_prefetch=0,
            grid=grid,
            in_specs=[
                pl.BlockSpec((tb, dvp), lambda i, j: (i, 0)),    # input_v tile
                pl.BlockSpec((tb, dqp), lambda i, j: (i, 0)),    # x_q tile
                pl.BlockSpec((dvp, dhp), lambda i, j: (0, 0)),   # w_v (resident)
                pl.BlockSpec((1, dhp), lambda i, j: (0, 0)),     # b_v
                pl.BlockSpec((dqp, dhp), lambda i, j: (0, 0)),   # w_q (resident)
                pl.BlockSpec((1, dhp), lambda i, j: (0, 0)),     # b_q
                pl.BlockSpec((dhp, tc), lambda i, j: (0, j)),    # w_c (streamed)
                pl.BlockSpec((1, tc), lambda i, j: (0, j)),      # b_c
            ],
            out_specs=pl.BlockSpec((tb, tc), lambda i, j: (i, j)),
            scratch_shapes=[pltpu.VMEM((tb, dhp), jnp.float32)],
        ),
        compiler_params=pltpu.CompilerParams(
            dimension_semantics=("parallel", "arbitrary"),
            vmem_limit_bytes=vmem_limit),
        cost_estimate=cost,
    )(v_p, q_p, wv_p, bv_p, wq_p, bq_p, wc_p, bc_p)

    return out_p[:B, :num_classes]


# ----------------------------------------------------------------------------
# seq2vec glue (embedding lookup + mean over sequence) — plain JAX
# ----------------------------------------------------------------------------
def seq2vec(input_q, embedding):
    # input_q: (B, seq) int32 token ids -> (B, dim_q) f32
    emb = jnp.take(embedding, input_q, axis=0)      # (B, seq, dim_q)
    return jnp.mean(emb, axis=1)                    # (B, dim_q)


# ----------------------------------------------------------------------------
# Deterministic parameter construction (shapes implied by __init__ / fusion)
# ----------------------------------------------------------------------------
def make_params(key, vocab_words, dim_q, dim_v, dim_h, num_classes):
    ks = jax.random.split(key, 7)
    scale = 0.05
    return {
        "embedding": scale * jax.random.normal(ks[0], (vocab_words, dim_q), jnp.float32),
        "w_v": scale * jax.random.normal(ks[1], (dim_v, dim_h), jnp.float32),
        "b_v": scale * jax.random.normal(ks[2], (1, dim_h), jnp.float32),
        "w_q": scale * jax.random.normal(ks[3], (dim_q, dim_h), jnp.float32),
        "b_q": scale * jax.random.normal(ks[4], (1, dim_h), jnp.float32),
        # nn.Linear(opt['fusion']['dim_h'], num_classes)
        "w_c": scale * jax.random.normal(ks[5], (dim_h, num_classes), jnp.float32),
        "b_c": scale * jax.random.normal(ks[6], (1, num_classes), jnp.float32),
    }


def reference_forward(input_v, x_q, p):
    # Mirrors the kernel's bf16-in / f32-accumulate matmul precision.
    bf, f32 = jnp.bfloat16, jnp.float32
    h_v = jnp.tanh(jnp.dot(input_v.astype(bf), p["w_v"].astype(bf),
                           preferred_element_type=f32) + p["b_v"])
    h_q = jnp.tanh(jnp.dot(x_q.astype(bf), p["w_q"].astype(bf),
                           preferred_element_type=f32) + p["b_q"])
    x = jnp.tanh(h_v * h_q)
    return jnp.dot(x.astype(bf), p["w_c"].astype(bf),
                   preferred_element_type=f32) + p["b_c"]


if __name__ == "__main__":
    B, SEQ = 4, 8
    VOCAB_WORDS = 50
    DIM_Q, DIM_V, DIM_H = 16, 16, 32
    NUM_CLASSES = 24  # len(vocab_answers)

    key = jax.random.PRNGKey(0)
    k_param, k_v, k_q = jax.random.split(key, 3)

    params = make_params(k_param, VOCAB_WORDS, DIM_Q, DIM_V, DIM_H, NUM_CLASSES)

    input_v = jax.random.normal(k_v, (B, DIM_V), jnp.float32)
    input_q = jax.random.randint(k_q, (B, SEQ), 0, VOCAB_WORDS, jnp.int32)

    # seq2vec (glue in plain JAX), fusion + classif in the Pallas kernel.
    x_q = seq2vec(input_q, params["embedding"])
    out = noatt_forward(input_v, x_q, params)
    out = jax.block_until_ready(out)

    ref = reference_forward(input_v, x_q, params)
    assert out.shape == (B, NUM_CLASSES)
    assert jnp.allclose(out, ref, atol=1e-2, rtol=1e-2), float(
        jnp.max(jnp.abs(out - ref)))

    print("KERNEL_OK")
</pallas_src>

<mosaic_0001>
module attributes {stable_mosaic.version = 11 : i64} {
  func.func @noatt_kernel(%arg0: i32, %arg1: i32, %arg2: memref<8x128xbf16, #tpu.memory_space<vmem>>, %arg3: memref<8x128xbf16, #tpu.memory_space<vmem>>, %arg4: memref<128x128xbf16, #tpu.memory_space<vmem>>, %arg5: memref<1x128xf32, #tpu.memory_space<vmem>>, %arg6: memref<128x128xbf16, #tpu.memory_space<vmem>>, %arg7: memref<1x128xf32, #tpu.memory_space<vmem>>, %arg8: memref<128x128xbf16, #tpu.memory_space<vmem>>, %arg9: memref<1x128xf32, #tpu.memory_space<vmem>>, %arg10: memref<8x128xf32, #tpu.memory_space<vmem>>, %arg11: memref<8x128xf32, #tpu.memory_space<vmem>>) attributes {dimension_semantics = [#tpu.dimension_semantics<parallel>, #tpu.dimension_semantics<arbitrary>], iteration_bounds = array<i64: 1, 1>, scalar_prefetch = 0 : i64, scratch_operands = 1 : i64, tpu.core_type = #tpu.core_type<tc>, window_params = [{transform_indices = @transform_0, window_bounds = array<i64: 8, 128>}, {transform_indices = @transform_1, window_bounds = array<i64: 8, 128>}, {pipeline_mode = #tpu.pipeline_mode<synchronous>, transform_indices = @transform_2, window_bounds = array<i64: 128, 128>}, {pipeline_mode = #tpu.pipeline_mode<synchronous>, transform_indices = @transform_3, window_bounds = array<i64: 1, 128>}, {pipeline_mode = #tpu.pipeline_mode<synchronous>, transform_indices = @transform_4, window_bounds = array<i64: 128, 128>}, {pipeline_mode = #tpu.pipeline_mode<synchronous>, transform_indices = @transform_5, window_bounds = array<i64: 1, 128>}, {transform_indices = @transform_6, window_bounds = array<i64: 128, 128>}, {transform_indices = @transform_7, window_bounds = array<i64: 1, 128>}, {transform_indices = @transform_8, window_bounds = array<i64: 8, 128>}]} {
    %c0_i32 = arith.constant 0 : i32
    %0 = arith.cmpi eq, %arg1, %c0_i32 : i32
    %1 = arith.extui %0 : i1 to i32
    %c0_i32_0 = arith.constant 0 : i32
    %2 = arith.cmpi ne, %1, %c0_i32_0 : i32
    scf.if %2 {
      %c0_8 = arith.constant 0 : index
      %c0_9 = arith.constant 0 : index
      %11 = vector.load %arg2[%c0_8, %c0_9] : memref<8x128xbf16, #tpu.memory_space<vmem>>, vector<8x128xbf16>
      %c0_10 = arith.constant 0 : index
      %c0_11 = arith.constant 0 : index
      %12 = vector.load %arg4[%c0_10, %c0_11] : memref<128x128xbf16, #tpu.memory_space<vmem>>, vector<128x128xbf16>
      %cst_12 = arith.constant dense<0.000000e+00> : vector<8x128xf32>
      %13 = tpu.matmul %11, %12, %cst_12 {dimension_numbers = #tpu.dot_dimension_numbers<[1], [0], [0], [1], [0, 0, 1, 1], [], []>} : vector<8x128xbf16>, vector<128x128xbf16>, vector<8x128xf32> -> vector<8x128xf32>
      %c0_13 = arith.constant 0 : index
      %c0_14 = arith.constant 0 : index
      %14 = vector.load %arg5[%c0_13, %c0_14] : memref<1x128xf32, #tpu.memory_space<vmem>>, vector<1x128xf32>
      %15 = vector.broadcast %14 : vector<1x128xf32> to vector<8x128xf32>
      %16 = arith.addf %13, %15 : vector<8x128xf32>
      %17 = math.tanh %16 : vector<8x128xf32>
      %c0_15 = arith.constant 0 : index
      %c0_16 = arith.constant 0 : index
      %18 = vector.load %arg3[%c0_15, %c0_16] : memref<8x128xbf16, #tpu.memory_space<vmem>>, vector<8x128xbf16>
      %c0_17 = arith.constant 0 : index
      %c0_18 = arith.constant 0 : index
      %19 = vector.load %arg6[%c0_17, %c0_18] : memref<128x128xbf16, #tpu.memory_space<vmem>>, vector<128x128xbf16>
      %cst_19 = arith.constant dense<0.000000e+00> : vector<8x128xf32>
      %20 = tpu.matmul %18, %19, %cst_19 {dimension_numbers = #tpu.dot_dimension_numbers<[1], [0], [0], [1], [0, 0, 1, 1], [], []>} : vector<8x128xbf16>, vector<128x128xbf16>, vector<8x128xf32> -> vector<8x128xf32>
      %c0_20 = arith.constant 0 : index
      %c0_21 = arith.constant 0 : index
      %21 = vector.load %arg7[%c0_20, %c0_21] : memref<1x128xf32, #tpu.memory_space<vmem>>, vector<1x128xf32>
      %22 = vector.broadcast %21 : vector<1x128xf32> to vector<8x128xf32>
      %23 = arith.addf %20, %22 : vector<8x128xf32>
      %24 = math.tanh %23 : vector<8x128xf32>
      %25 = arith.mulf %17, %24 : vector<8x128xf32>
      %26 = math.tanh %25 : vector<8x128xf32>
      %c0_22 = arith.constant 0 : index
      %c0_23 = arith.constant 0 : index
      %27 = vector.load %arg11[%c0_22, %c0_23] : memref<8x128xf32, #tpu.memory_space<vmem>>, vector<8x128xf32>
      tpu.vector_store %arg11[%c0_22, %c0_23], %26 {strides = array<i32>} : memref<8x128xf32, #tpu.memory_space<vmem>>, vector<8x128xf32>,
    } else {
    }
    %c0 = arith.constant 0 : index
    %c0_1 = arith.constant 0 : index
    %3 = vector.load %arg11[%c0, %c0_1] : memref<8x128xf32, #tpu.memory_space<vmem>>, vector<8x128xf32>
    %4 = arith.truncf %3 : vector<8x128xf32> to vector<8x128xbf16>
    %c0_2 = arith.constant 0 : index
    %c0_3 = arith.constant 0 : index
    %5 = vector.load %arg8[%c0_2, %c0_3] : memref<128x128xbf16, #tpu.memory_space<vmem>>, vector<128x128xbf16>
    %cst = arith.constant dense<0.000000e+00> : vector<8x128xf32>
    %6 = tpu.matmul %4, %5, %cst {dimension_numbers = #tpu.dot_dimension_numbers<[1], [0], [0], [1], [0, 0, 1, 1], [], []>} : vector<8x128xbf16>, vector<128x128xbf16>, vector<8x128xf32> -> vector<8x128xf32>
    %c0_4 = arith.constant 0 : index
    %c0_5 = arith.constant 0 : index
    %7 = vector.load %arg9[%c0_4, %c0_5] : memref<1x128xf32, #tpu.memory_space<vmem>>, vector<1x128xf32>
    %8 = vector.broadcast %7 : vector<1x128xf32> to vector<8x128xf32>
    %9 = arith.addf %6, %8 : vector<8x128xf32>
    %c0_6 = arith.constant 0 : index
    %c0_7 = arith.constant 0 : index
    %10 = vector.load %arg10[%c0_6, %c0_7] : memref<8x128xf32, #tpu.memory_space<vmem>>, vector<8x128xf32>
    tpu.vector_store %arg10[%c0_6, %c0_7], %9 {strides = array<i32>} : memref<8x128xf32, #tpu.memory_space<vmem>>, vector<8x128xf32>,
    return
  }
  func.func @transform_0(%arg0: i32, %arg1: i32) -> (i32, i32) {
    %c0_i32 = arith.constant 0 : i32
    %c0_i32_0 = arith.constant 0 : i32
    return %arg0, %c0_i32 : i32, i32
  }
  func.func @transform_1(%arg0: i32, %arg1: i32) -> (i32, i32) {
    %c0_i32 = arith.constant 0 : i32
    %c0_i32_0 = arith.constant 0 : i32
    return %arg0, %c0_i32 : i32, i32
  }
  func.func @transform_2(%arg0: i32, %arg1: i32) -> (i32, i32) {
    %c0_i32 = arith.constant 0 : i32
    %c0_i32_0 = arith.constant 0 : i32
    %c0_i32_1 = arith.constant 0 : i32
    return %c0_i32, %c0_i32_0 : i32, i32
  }
  func.func @transform_3(%arg0: i32, %arg1: i32) -> (i32, i32) {
    %c0_i32 = arith.constant 0 : i32
    %c0_i32_0 = arith.constant 0 : i32
    %c0_i32_1 = arith.constant 0 : i32
    return %c0_i32, %c0_i32_0 : i32, i32
  }
  func.func @transform_4(%arg0: i32, %arg1: i32) -> (i32, i32) {
    %c0_i32 = arith.constant 0 : i32
    %c0_i32_0 = arith.constant 0 : i32
    %c0_i32_1 = arith.constant 0 : i32
    return %c0_i32, %c0_i32_0 : i32, i32
  }
  func.func @transform_5(%arg0: i32, %arg1: i32) -> (i32, i32) {
    %c0_i32 = arith.constant 0 : i32
    %c0_i32_0 = arith.constant 0 : i32
    %c0_i32_1 = arith.constant 0 : i32
    return %c0_i32, %c0_i32_0 : i32, i32
  }
  func.func @transform_6(%arg0: i32, %arg1: i32) -> (i32, i32) {
    %c0_i32 = arith.constant 0 : i32
    %c0_i32_0 = arith.constant 0 : i32
    return %c0_i32, %arg1 : i32, i32
  }
  func.func @transform_7(%arg0: i32, %arg1: i32) -> (i32, i32) {
    %c0_i32 = arith.constant 0 : i32
    %c0_i32_0 = arith.constant 0 : i32
    return %c0_i32, %arg1 : i32, i32
  }
  func.func @transform_8(%arg0: i32, %arg1: i32) -> (i32, i32) {
    %c0_i32 = arith.constant 0 : i32
    return %arg0, %arg1 : i32, i32
  }
}

</mosaic_0001>

<bundles_post_ra>
// kernel: tpu_custom_call.1
= control target key start
LH: loop header
LB: loop body
LE: loop exit
PB: predicated region body
PF: predicated region fallthrough
CT: control target
= control target key end

     0   :  { %13 = vsyncpa [#allocation4], 0  ;;  %s928_s0 = inlined_call_operand.hbm [shape: bf16[8,128], index: 0, kind: input, shape index: {}]   ;;  %s929_s1 = inlined_call_operand.hbm [shape: bf16[8,128], index: 1, kind: input, shape index: {}]   ;;  %s930_s2 = inlined_call_operand.hbm [shape: bf16[128,128], index: 2, kind: input, shape index: {}]   ;;  %s931_s3 = inlined_call_operand.vmem [shape: f32[1,128], index: 3, kind: input, shape index: {}]   ;;  %s932_s4 = inlined_call_operand.hbm [shape: bf16[128,128], index: 4, kind: input, shape index: {}]   ;;  %s933_s5 = inlined_call_operand.vmem [shape: f32[1,128], index: 5, kind: input, shape index: {}]   ;;  %s934_s6 = inlined_call_operand.hbm [shape: bf16[128,128], index: 6, kind: input, shape index: {}]   ;;  %s935_s7 = inlined_call_operand.vmem [shape: f32[1,128], index: 7, kind: input, shape index: {}]   ;;  %s936_s8 = inlined_call_operand.hbm [shape: f32[8,128], index: 8, kind: output, shape index: {}]  }
   0x1   :  { %14 = vsyncpa [#allocation7], 0 }
   0x2   :  { %15 = vsyncpa [#allocation10], 0 }
   0x3   :  { %16 = vsyncpa [#allocation5], 0  ;;  %s753_s27 = smov [#allocation6]   ;;  %s613_s9 = scalar_lea.hbm %s929_s1, 64 }
   0x4   :  { %s33_s28 = sshll.u32 %s753_s27, 4  ;;  %p614_p0 = scmp.ne.s32.totalorder %s929_s1, %s613_s9  ;;  %s34_s28 = int_to_ptr.vmem [resolvable:$true] %s33_s28 }
   0x5   :  { %p617_p1 = scmp.lt.u32.totalorder %s613_s9, %s929_s1 }
   0x7   :  { %p619_p2 = pnand %p617_p1, %p614_p0 }
   0x9   :  { %622 = shalt.err (!%p619_p2)
}
   0xa   :  { %s623_s14 = scalar_lea.vmem %s34_s28, 64  ;;  %p628_p4 = scmp.lt.s32.totalorder %s34_s28, %s34_s28 }
   0xb   :  { %p624_p3 = scmp.ne.s32.totalorder %s34_s28, %s623_s14  ;;  %p629_p5 = scmp.lt.s32.totalorder %s623_s14, %s623_s14 }
   0xd   :  { %p630_p6 = por %p629_p5, %p628_p4 }
   0xf   :  { %p631_p7 = pnand %p630_p6, %p624_p3 }
  0x11   :  { %634 = shalt.err (!%p631_p7)
}
  0x12   :  { %36 = dma.hbm_to_vmem [thread:$0]  %s929_s1, 64, %s34_s28, [#allocation7]  }
  0x13   :  { %s754_s17 = smov [#allocation9]   ;;  %s755_s19 = smov [#allocation3]  }
  0x14   :  { %s56_s18 = sshll.u32 %s754_s17, 4  ;;  %s23_s20 = sshll.u32 %s755_s19, 4  ;;  %s57_s18 = int_to_ptr.vmem [resolvable:$true] %s56_s18  ;;  %s24_s20 = int_to_ptr.vmem [resolvable:$true] %s23_s20 }
  0x15   :  { %s635_s23 = scalar_lea.hbm %s932_s4, 1024 }
  0x16   :  { %p636_p8 = scmp.ne.s32.totalorder %s932_s4, %s635_s23  ;;  %p639_p9 = scmp.lt.u32.totalorder %s635_s23, %s932_s4 }
  0x18   :  { %p641_p10 = pnand %p639_p9, %p636_p8 }
  0x1a   :  { %644 = shalt.err (!%p641_p10)
}
  0x1b   :  { %s645_s1 = scalar_lea.vmem %s57_s18, 1024  ;;  %p650_p12 = scmp.lt.s32.totalorder %s57_s18, %s57_s18 }
  0x1c   :  { %p646_p11 = scmp.ne.s32.totalorder %s57_s18, %s645_s1  ;;  %p651_p13 = scmp.lt.s32.totalorder %s645_s1, %s645_s1 }
  0x1e   :  { %p652_p0 = por %p651_p13, %p650_p12 }
  0x20   :  { %p653_p1 = pnand %p652_p0, %p646_p11 }
  0x22   :  { %656 = shalt.err (!%p653_p1)
}
  0x23   :  { %s756_s28 = smov 64   ;;  %s757_s29 = smov 4  }
  0x24   :  { %62 = dma.hbm_to_vmem [thread:$0]  %s932_s4, 1024, %s57_s18, [#allocation10], %s756_s28, %s756_s28, %s757_s29  }
  0x25   :  { %s657_s12 = scalar_lea.hbm %s928_s0, 64 }
  0x26   :  { %p658_p2 = scmp.ne.s32.totalorder %s928_s0, %s657_s12  ;;  %p661_p3 = scmp.lt.u32.totalorder %s657_s12, %s928_s0 }
  0x28   :  { %p663_p4 = pnand %p661_p3, %p658_p2 }
  0x2a   :  { %666 = shalt.err (!%p663_p4)
}
  0x2b   :  { %s667_s17 = scalar_lea.vmem %s24_s20, 64  ;;  %p672_p6 = scmp.lt.s32.totalorder %s24_s20, %s24_s20 }
  0x2c   :  { %p668_p5 = scmp.ne.s32.totalorder %s24_s20, %s667_s17  ;;  %p673_p7 = scmp.lt.s32.totalorder %s667_s17, %s667_s17 }
  0x2e   :  { %p674_p8 = por %p673_p7, %p672_p6 }
  0x30   :  { %p675_p9 = pnand %p674_p8, %p668_p5 }
  0x32   :  { %678 = shalt.err (!%p675_p9)
}
  0x33   :  { %26 = dma.hbm_to_vmem [thread:$0]  %s928_s0, 64, %s24_s20, [#allocation4]  }
  0x34   :  { %s758_s19 = smov [#allocation8]   ;;  %s759_s22 = smov [#allocation11]  }
  0x35   :  { %s42_s21 = sshll.u32 %s758_s19, 4  ;;  %s70_s23 = sshll.u32 %s759_s22, 4  ;;  %s43_s21 = int_to_ptr.vmem [resolvable:$true] %s42_s21  ;;  %s71_s23 = int_to_ptr.vmem [resolvable:$true] %s70_s23 }
  0x36   :  { %s679_s26 = scalar_lea.hbm %s930_s2, 1024 }
  0x37   :  { %p680_p10 = scmp.ne.s32.totalorder %s930_s2, %s679_s26  ;;  %p683_p11 = scmp.lt.u32.totalorder %s679_s26, %s930_s2 }
  0x39   :  { %p685_p12 = pnand %p683_p11, %p680_p10 }
  0x3b   :  { %688 = shalt.err (!%p685_p12)
}
  0x3c   :  { %s689_s0 = scalar_lea.vmem %s43_s21, 1024  ;;  %p694_p0 = scmp.lt.s32.totalorder %s43_s21, %s43_s21 }
  0x3d   :  { %p690_p13 = scmp.ne.s32.totalorder %s43_s21, %s689_s0  ;;  %p695_p1 = scmp.lt.s32.totalorder %s689_s0, %s689_s0 }
  0x3f   :  { %p696_p2 = por %p695_p1, %p694_p0 }
  0x41   :  { %p697_p3 = pnand %p696_p2, %p690_p13 }
  0x43   :  { %700 = shalt.err (!%p697_p3)
}
  0x44   :  { %48 = dma.hbm_to_vmem [thread:$0]  %s930_s2, 1024, %s43_s21, [#allocation7], %s756_s28, %s756_s28, %s757_s29  }
  0x45   :  { %s701_s13 = scalar_lea.hbm %s934_s6, 1024 }
  0x46   :  { %p702_p4 = scmp.ne.s32.totalorder %s934_s6, %s701_s13  ;;  %p705_p5 = scmp.lt.u32.totalorder %s701_s13, %s934_s6 }
  0x48   :  { %p707_p6 = pnand %p705_p5, %p702_p4 }
  0x4a   :  { %710 = shalt.err (!%p707_p6)
}
  0x4b   :  { %s711_s4 = scalar_lea.vmem %s71_s23, 1024  ;;  %p716_p8 = scmp.lt.s32.totalorder %s71_s23, %s71_s23 }
  0x4c   :  { %p712_p7 = scmp.ne.s32.totalorder %s71_s23, %s711_s4  ;;  %p717_p9 = scmp.lt.s32.totalorder %s711_s4, %s711_s4 }
  0x4e   :  { %p718_p10 = por %p717_p9, %p716_p8 }
  0x50   :  { %p719_p11 = pnand %p718_p10, %p712_p7 }
  0x52   :  { %722 = shalt.err (!%p719_p11)
}
  0x53   :  { %76 = dma.hbm_to_vmem [thread:$0]  %s934_s6, 1024, %s71_s23, [#allocation10], %s756_s28, %s756_s28, %s757_s29  }
  0x54   :  { %745 = dma.done.wait [#allocation4], 64  }
  0x55   :  { %746 = vsyncadd [#allocation4], 4294967232 }
  0x56   :  { %747 = dma.done.wait [#allocation7], 1088  }
  0x57   :  { %748 = vsyncadd [#allocation7], 4294966208 }
  0x58   :  { %749 = dma.done.wait [#allocation10], 2048  }
  0x59   :  { %750 = vsyncadd [#allocation10], 4294965248  ;;  %v760_v0 = vmov 0.0   ;;  %vm761_vm0 = vmmov 0   ;;  %v583_v1 = vld [vmem:[#allocation8] sm:$0xff]   ;;  %v585_v3 = vld [vmem:[#allocation8 + $0x8] sm:$0xff]  }
  0x5a   :  { %513 = vmatprep.subr.bf16.mxu0 %v760_v0  ;;  %533 = vmatprep.subr.bf16.mxu1 %v760_v0  ;;  %v584_v2 = vld [vmem:[#allocation9] sm:$0xff]   ;;  %v586_v4 = vld [vmem:[#allocation9 + $0x8] sm:$0xff]   ;;  %v587_v5 = vld [vmem:[#allocation8 + $0x10] sm:$0xff]   ;;  %s762_s21 = smov [#allocation12]  }
  0x5b   :  { %529 = vmatprep.mubr.msk.bf16.mxu0 %vm761_vm0, %v760_v0  ;;  %549 = vmatprep.mubr.msk.bf16.mxu1 %vm761_vm0, %v760_v0  ;;  %v588_v6 = vld [vmem:[#allocation9 + $0x10] sm:$0xff]   ;;  %v589_v7 = vld [vmem:[#allocation8 + $0x18] sm:$0xff]   ;;  %v591_v9 = vld [vmem:[#allocation8 + $0x20] sm:$0xff]   ;;  %s448_s22 = sshll.u32 %s762_s21, 4  ;;  %s449_s22 = int_to_ptr.vmem [resolvable:$true] %s448_s22 }
  0x5c   :  { %514 = vmatpush3.bf16.msra.mxu0 %v583_v1  ;;  %534 = vmatpush3.bf16.msra.mxu1 %v584_v2  ;;  %v590_v8 = vld [vmem:[#allocation9 + $0x18] sm:$0xff]   ;;  %v592_v10 = vld [vmem:[#allocation9 + $0x20] sm:$0xff]   ;;  %v593_v11 = vld [vmem:[#allocation8 + $0x28] sm:$0xff]   ;;  %s723_s23 = scalar_lea.vmem %s449_s22, 128  ;;  %p728_p13 = scmp.lt.s32.totalorder %s449_s22, %s449_s22 }
  0x5d   :  { %515 = vmatprep.subr.bf16.mxu0 %v760_v0  ;;  %535 = vmatprep.subr.bf16.mxu1 %v760_v0  ;;  %v594_v12 = vld [vmem:[#allocation9 + $0x28] sm:$0xff]   ;;  %v595_v13 = vld [vmem:[#allocation8 + $0x30] sm:$0xff]   ;;  %v597_v15 = vld [vmem:[#allocation8 + $0x38] sm:$0xff]   ;;  %p724_p12 = scmp.ne.s32.totalorder %s449_s22, %s723_s23  ;;  %p729_p0 = scmp.lt.s32.totalorder %s723_s23, %s723_s23 }
  0x5e   :  { %v596_v14 = vld [vmem:[#allocation9 + $0x30] sm:$0xff]   ;;  %v598_v16 = vld [vmem:[#allocation9 + $0x38] sm:$0xff]   ;;  %v599_v18 = vld [vmem:[#allocation11] sm:$0xff]  }
  0x5f   :  { %v99_v17 = vld [vmem:[#allocation3] sm:$0xf]  ;;  %v212_v19 = vld [vmem:[#allocation6] sm:$0xf]  ;;  %v600_v20 = vld [vmem:[#allocation11 + $0x8] sm:$0xff]   ;;  %p730_p1 = por %p729_p0, %p728_p13 }
  0x60   :  { %516 = vmatpush3.bf16.msra.mxu0 %v585_v3  ;;  %536 = vmatpush3.bf16.msra.mxu1 %v586_v4  ;;  %v601_v21 = vld [vmem:[#allocation11 + $0x10] sm:$0xff]   ;;  %v602_v22 = vld [vmem:[#allocation11 + $0x18] sm:$0xff]   ;;  %v603_v23 = vld [vmem:[#allocation11 + $0x20] sm:$0xff]  }
  0x61   :  { %517 = vmatprep.subr.bf16.mxu0 %v760_v0  ;;  %537 = vmatprep.subr.bf16.mxu1 %v760_v0  ;;  %v604_v24 = vld [vmem:[#allocation11 + $0x28] sm:$0xff]   ;;  %v605_v25 = vld [vmem:[#allocation11 + $0x30] sm:$0xff]   ;;  %v606_v26 = vld [vmem:[#allocation11 + $0x38] sm:$0xff]   ;;  %p731_p2 = pnand %p730_p1, %p724_p12 }
  0x62   :  { %v459_v27 = vld [vmem:[%s931_s3] ss:$0 sm:$0xff] }
  0x63   :  { %v468_v28 = vld [vmem:[%s933_s5] ss:$0 sm:$0xff] }
  0x64   :  { %518 = vmatpush3.bf16.msra.mxu0 %v587_v5  ;;  %538 = vmatpush3.bf16.msra.mxu1 %v588_v6  ;;  %v477_v44 = vld [vmem:[%s935_s7] ss:$0 sm:$0xff] }
  0x65   :  { %519 = vmatprep.subr.bf16.mxu0 %v760_v0  ;;  %539 = vmatprep.subr.bf16.mxu1 %v760_v0 }
  0x68   :  { %520 = vmatpush3.bf16.msra.mxu0 %v589_v7  ;;  %540 = vmatpush3.bf16.msra.mxu1 %v590_v8 }
  0x69   :  { %521 = vmatprep.subr.bf16.mxu0 %v760_v0  ;;  %541 = vmatprep.subr.bf16.mxu1 %v760_v0 }
  0x6c   :  { %522 = vmatpush3.bf16.msra.mxu0 %v591_v9  ;;  %542 = vmatpush3.bf16.msra.mxu1 %v592_v10 }
  0x6d   :  { %523 = vmatprep.subr.bf16.mxu0 %v760_v0  ;;  %543 = vmatprep.subr.bf16.mxu1 %v760_v0 }
  0x70   :  { %524 = vmatpush3.bf16.msra.mxu0 %v593_v11  ;;  %544 = vmatpush3.bf16.msra.mxu1 %v594_v12 }
  0x71   :  { %525 = vmatprep.subr.bf16.mxu0 %v760_v0  ;;  %545 = vmatprep.subr.bf16.mxu1 %v760_v0 }
  0x74   :  { %526 = vmatpush3.bf16.msra.mxu0 %v595_v13  ;;  %546 = vmatpush3.bf16.msra.mxu1 %v596_v14 }
  0x75   :  { %527 = vmatprep.subr.bf16.mxu0 %v760_v0  ;;  %547 = vmatprep.subr.bf16.mxu1 %v760_v0 }
  0x78   :  { %528 = vmatpush3.bf16.msra.mxu0 %v597_v15  ;;  %548 = vmatpush3.bf16.msra.mxu1 %v598_v16 }
  0x79   :  { %553 = vmatprep.subr.bf16.mxu0 %v760_v0 }
  0x7b   :  { %530 = vmatmul.mubr.bf16.vlgmr.msra.gmra.mrb[0].mxu0 %v99_v17  ;;  %550 = vmatmul.mubr.bf16.vlgmr.msra.gmra.mrb[0].mxu1 %v212_v19 }
  0x7c   :  { %554 = vmatpush3.bf16.msra.mxu0 %v599_v18  ;;  %569 = vmatprep.mubr.msk.bf16.mxu0 %vm761_vm0, %v760_v0 }
  0x7d   :  { %555 = vmatprep.subr.bf16.mxu0 %v760_v0 }
  0x80   :  { %556 = vmatpush3.bf16.msra.mxu0 %v600_v20 }
  0x81   :  { %557 = vmatprep.subr.bf16.mxu0 %v760_v0 }
  0x84   :  { %558 = vmatpush3.bf16.msra.mxu0 %v601_v21 }
  0x85   :  { %559 = vmatprep.subr.bf16.mxu0 %v760_v0 }
  0x88   :  { %560 = vmatpush3.bf16.msra.mxu0 %v602_v22 }
  0x89   :  { %561 = vmatprep.subr.bf16.mxu0 %v760_v0 }
  0x8c   :  { %562 = vmatpush3.bf16.msra.mxu0 %v603_v23 }
  0x8d   :  { %563 = vmatprep.subr.bf16.mxu0 %v760_v0 }
  0x90   :  { %564 = vmatpush3.bf16.msra.mxu0 %v604_v24 }
  0x91   :  { %565 = vmatprep.subr.bf16.mxu0 %v760_v0 }
  0x94   :  { %566 = vmatpush3.bf16.msra.mxu0 %v605_v25 }
  0x95   :  { %567 = vmatprep.subr.bf16.mxu0 %v760_v0 }
  0x98   :  { %568 = vmatpush3.bf16.msra.mxu0 %v606_v26 }
 0x14e   :  { %v205_v29 = vpop.f32.mrb[0].mxu0  ;;  %v318_v31 = vpop.f32.mrb[0].mxu1 }
 0x14f   :  { %v206_v30 = vadd.f32 %v459_v27, %v205_v29  ;;  %v531_v32 = vpop.f32.mrb[1].mxu0  ;;  %v319_v33 = vadd.f32 %v468_v28, %v318_v31  ;;  %v551_v34 = vpop.f32.mrb[1].mxu1 }
 0x150   :  { %v208_v35 = vpop.f32.mrb[2].mxu0  ;;  %v321_v36 = vpop.f32.mrb[2].mxu1 }
 0x151   :  { %607 = vtanh.f32 %v206_v30  ;;  %v532_v37 = vpop.f32.mrb[3].mxu0  ;;  %v552_v38 = vpop.f32.mrb[3].mxu1 }
 0x152   :  { %609 = vtanh.f32 %v319_v33 }
 0x15b   :  { %v608_v39 = vpop.eup %607 }
 0x15c   :  { %v610_v40 = vpop.eup %609 }
 0x15d   :  { %v325_v41 = vmul.f32 %v610_v40, %v608_v39 }
 0x15f   :  { %611 = vtanh.f32 %v325_v41 }
 0x169   :  { %v612_v42 = vpop.eup %611 }
 0x16a   :  { %v329_v43 = vpack.c.bf16 %v612_v42, %v612_v42 }
 0x16c   :  { %570 = vmatmul.mubr.bf16.vlgmr.msra.gmra.mrb[4].mxu0 %v329_v43 }
 0x23f   :  { %v435_v45 = vpop.f32.mrb[4].mxu0 }
 0x240   :  { %v436_v46 = vadd.f32 %v477_v44, %v435_v45  ;;  %v571_v47 = vpop.f32.mrb[5].mxu0 }
 0x241   :  { %v438_v48 = vpop.f32.mrb[6].mxu0 }
 0x242   :  { %441 = vst [vmem:[#allocation12] sm:$0xff] %v436_v46  ;;  %v572_v49 = vpop.f32.mrb[7].mxu0 }
 0x243   :  { %734 = shalt.err (!%p731_p2)
}
 0x244   :  { %s735_s7 = scalar_lea.hbm %s936_s8, 128 }
 0x245   :  { %p736_p3 = scmp.ne.s32.totalorder %s936_s8, %s735_s7  ;;  %p739_p4 = scmp.lt.u32.totalorder %s735_s7, %s936_s8 }
 0x247   :  { %p741_p5 = pnand %p739_p4, %p736_p3 }
 0x249   :  { %744 = shalt.err (!%p741_p5)
}
 0x24a   :  { %451 = dma.vmem_to_hbm [thread:$0]  %s449_s22, 128, %s936_s8, [#allocation5]  }
 0x24b   :  { %751 = dma.done.wait [#allocation5], 128  }
 0x24c   :  { %752 = vsyncadd [#allocation5], 4294967168 }
 0x24d   :  { %455 = vsyncpa [#allocation4], 1 }
 0x24e   :  { %456 = vsyncpa [#allocation7], 1 }
 0x24f   :  { %457 = vsyncpa [#allocation10], 1 }
 0x250   :  { %458 = vsyncpa [#allocation5], 1 }

</bundles_post_ra>
